<compile_context>
chip_gen: v6e
topology: v6e:2x2x1
jax: 0.10.0
libtpu: 0.0.40
codegen_flags: <defaults>
</compile_context>

<pallas_src>
import math
import numpy as np

import jax
import jax.numpy as jnp
from jax import lax
from jax.experimental import pallas as pl
from jax.experimental.pallas import tpu as pltpu


# ----------------------------------------------------------------------------
# Pallas kernel: per-(b, t-block) two-sided resampling matmul over all channels
# ----------------------------------------------------------------------------
def _make_frame_resample_kernel(C, H, W, t_blk, fuse_channels,
                                compute_dtype=jnp.bfloat16):
    CH = C * H

    def kernel(combo_ref, clip_ref, mh_ref, mwT_ref, x_ref, o_ref):
        b = pl.program_id(0)
        do_clip = clip_ref[b] != 0
        # Scalar clip bounds (no-op bounds when this batch element has no shake).
        lo = jnp.where(do_clip, jnp.float32(0.0), jnp.float32(-3.0e38))
        hi = jnp.where(do_clip, jnp.float32(1.0), jnp.float32(3.0e38))

        def process_frame(t):
            mh = mh_ref[0, pl.ds(t, 1)][0].astype(compute_dtype)     # (M, M)
            mwT = mwT_ref[0, pl.ds(t, 1)][0].astype(compute_dtype)   # (W, W) = Mw^T
            x = x_ref[0, :, pl.ds(t, 1)].astype(compute_dtype)       # (C, 1, H, W)
            if fuse_channels:
                # Block-diagonal Mh: one wide left matmul for all channels.
                y = jnp.dot(mh, x.reshape(CH, W),
                            preferred_element_type=jnp.float32)      # (CH, W)
            else:
                # Per-channel left matmul, stacked into a (C*H, W) slab.
                y = jnp.concatenate(
                    [jnp.dot(mh, x[c, 0], preferred_element_type=jnp.float32)
                     for c in range(C)], axis=0)                     # (CH, W)
            # One fused right matmul for the whole frame.
            o = jnp.dot(y.astype(compute_dtype), mwT,
                        preferred_element_type=jnp.float32)          # (CH, W)
            o = jnp.minimum(jnp.maximum(o, lo), hi)
            o_ref[0, :, pl.ds(t, 1)] = o.reshape(C, 1, H, W).astype(o_ref.dtype)

        if t_blk <= 8:
            # Small trip-count: static unroll keeps the LLO scheduler's view flat.
            for t in range(t_blk):
                process_frame(t)
        else:
            # Large t_blk: bound code size / vreg live ranges with a real loop.
            def loop_body(t, carry):
                process_frame(t)
                return carry
            lax.fori_loop(0, t_blk, loop_body, 0)

    return kernel


def _pick_t_blk(B, T, per_frame_bytes,
                budget_bytes=28 * 1024 * 1024, min_steps=8):
    """Largest divisor of T whose double-buffered block set fits the budget,
    preferring choices that keep at least `min_steps` grid steps (v7x 2-TC)."""
    divisors = [d for d in range(1, T + 1) if T % d == 0]
    fits = [d for d in divisors if 2 * d * per_frame_bytes <= budget_bytes] or [1]
    ok = [d for d in fits if B * (T // d) >= min_steps]
    return max(ok) if ok else max(fits)


def apply_frame_resample(video_ncthw, mh, mwT, combo_idx, clip_flag, *,
                         fuse_channels):
    """video: [B,C,T,H,W]; mh: [n_combo,T,M,M] (M=C*H if fused else H);
    mwT: [n_combo,T,W,W]; combo_idx, clip_flag: [B] int32."""
    B, C, T, H, W = video_ncthw.shape
    Mdim = mh.shape[-1]
    x_bytes = video_ncthw.dtype.itemsize
    m_bytes = mh.dtype.itemsize
    per_frame = (2 * C * H * W * x_bytes                       # x block + out block
                 + (Mdim * Mdim + W * W) * m_bytes)            # Mh + MwT blocks
    t_blk = _pick_t_blk(B, T, per_frame)
    kernel = _make_frame_resample_kernel(C, H, W, t_blk, fuse_channels)
    return pl.pallas_call(
        kernel,
        out_shape=jax.ShapeDtypeStruct((B, C, T, H, W), video_ncthw.dtype),
        grid_spec=pltpu.PrefetchScalarGridSpec(
            num_scalar_prefetch=2,                             # combo_idx, clip_flag
            grid=(B, T // t_blk),
            in_specs=[
                pl.BlockSpec((1, t_blk, Mdim, Mdim),
                             lambda b, tb, combo, clip: (combo[b], tb, 0, 0)),
                pl.BlockSpec((1, t_blk, W, W),
                             lambda b, tb, combo, clip: (combo[b], tb, 0, 0)),
                pl.BlockSpec((1, C, t_blk, H, W),
                             lambda b, tb, combo, clip: (b, 0, tb, 0, 0)),
            ],
            out_specs=pl.BlockSpec((1, C, t_blk, H, W),
                                   lambda b, tb, combo, clip: (b, 0, tb, 0, 0)),
        ),
        compiler_params=pltpu.CompilerParams(
            dimension_semantics=("parallel", "parallel"),
            vmem_limit_bytes=48 * 1024 * 1024),
    )(combo_idx, clip_flag, mh, mwT, video_ncthw)


# ----------------------------------------------------------------------------
# Host-side glue: PyTorch-style linear/bilinear resampling matrices
# ----------------------------------------------------------------------------
def _linear_matrix(out_size, in_size, scale=None):
    """Row-resampling matrix (out_size, in_size); PyTorch linear/bilinear/
    trilinear, align_corners=False.  `scale=None` -> size-based; else the given
    scale_factor is used directly."""
    A = np.zeros((out_size, in_size), dtype=np.float32)
    inv_scale = (in_size / out_size) if scale is None else (1.0 / scale)
    for o in range(out_size):
        src = (o + 0.5) * inv_scale - 0.5
        src = max(src, 0.0)
        i0 = int(math.floor(src))
        t = src - i0
        i0c = min(i0, in_size - 1)
        i1c = min(i0 + 1, in_size - 1)
        A[o, i0c] += (1.0 - t)
        A[o, i1c] += t
    return A


class TransformCamera:
    """JAX/Pallas port of Transform_Camera (forward pass)."""

    def __init__(self, prob_shift, prob_zoom, prob_shake, n_steps):
        assert 0 <= prob_shift <= 1
        assert 0 <= prob_zoom <= 1
        assert 0 <= prob_shake <= 1
        assert n_steps > 0
        self.prob_shift, self.prob_zoom = prob_shift, prob_zoom
        self.prob_shake, self.n_steps = prob_shake, n_steps
        self.ampl_min = (1, 2)
        self.ampl_max = (2, 4)
        self.slope_ampl_min = (self.ampl_min[1] - self.ampl_min[0]) / n_steps
        self.slope_ampl_max = (self.ampl_max[1] - self.ampl_max[0]) / n_steps
        self.time = (0.1, 1.0)
        self.slope_time = (self.time[1] - self.time[0]) / n_steps
        self.speed_shift = (0.2, 1.0)
        self.slope_speed_shift = (self.speed_shift[1] - self.speed_shift[0]) / n_steps
        self.speed_zoom = (0.3, 1.0)
        self.slope_speed_zoom = (self.speed_zoom[1] - self.speed_zoom[0]) / n_steps

    # -- parameter sampling (deterministic, host side) -------------------------
    def _sample_params_shift(self, n_frames, step, res, rng):
        if step >= self.n_steps:
            speed_max = self.speed_shift[1]
            time_max = self.time[1]
        else:
            speed_max = self.speed_shift[0] + step * self.slope_speed_shift
            time_max = self.time[0] + step * self.slope_time
        speed_max = max(1, speed_max * res / n_frames)
        speed_min = max(1, self.speed_shift[0] * res / n_frames)
        speed = float(rng.uniform(speed_min, speed_max))
        time_max = min(n_frames, max(2, int(time_max * n_frames)))
        time_min = min(n_frames, max(2, int(self.time[0] * n_frames)))
        time = int(rng.randint(time_min, time_max + 1))
        angle = float(rng.uniform(0.0, 2.0 * math.pi))
        return speed, time, angle

    def _sample_params_zoom(self, step, n_frames, rng):
        if step >= self.n_steps:
            speed_max = self.speed_zoom[1]
            time_max = self.time[1]
        else:
            speed_max = self.speed_zoom[0] + step * self.slope_speed_zoom
            time_max = self.time[0] + step * self.slope_time
        speed_max = speed_max / n_frames
        speed_min = self.speed_zoom[0] / n_frames
        speed = float(rng.uniform(speed_min, speed_max))
        time_max = min(n_frames, max(2, int(time_max * n_frames)))
        time_min = min(n_frames, max(2, int(self.time[0] * n_frames)))
        time = int(rng.randint(time_min, time_max + 1))
        return speed, time

    def _sample_ampl_shake(self, step, rng):
        if step >= self.n_steps:
            min_, max_ = self.ampl_min[1], self.ampl_max[1]
        else:
            min_ = self.ampl_min[0] + step * self.slope_ampl_min
            max_ = self.ampl_max[0] + step * self.slope_ampl_max
        return float(rng.uniform(min_, max_))

    def _sample_params_shake(self, n_frames, ampl, res, rng):
        n_sin = int(rng.randint(2, 6))                       # random.randint(2, 5)
        freq = rng.uniform(0.1, 1.2, size=n_sin)
        phase = float(rng.uniform(0.0, 2.0 * math.pi))
        noise = rng.uniform(-0.3, 0.3, size=n_frames)
        t = np.arange(n_frames, dtype=np.float64)
        weight = 1.0 / np.arange(1, 1 + n_sin, dtype=np.float64)[None, :]
        shake = (weight * np.sin(np.outer(t, freq) + phase)).sum(axis=1) + noise
        shake = shake * ampl / shake.std(ddof=1) * res / 112.0   # torch.std unbiased
        return np.round(shake).astype(np.int32)

    # -- per-stage (T, H, H)/(T, W, W) resampling matrices ----------------------
    def _shift_matrices(self, T, H, W, step, rng):
        speed, time, angle = self._sample_params_shift(T, step, H, rng)
        time_before = int(rng.randint(0, T - time + 1))
        curve = np.arange(time, dtype=np.float32) * speed
        curve_h = (math.sin(angle) * curve).astype(np.int32)
        curve_w = (math.cos(angle) * curve).astype(np.int32)
        end_h, end_w = int(curve_h[-1]), int(curve_w[-1])
        min_h, min_w = min(0, end_h), min(0, end_w)
        diff_h, diff_w = abs(end_h) + 1, abs(end_w) + 1
        diff = max(diff_h, diff_w)
        Lh = _linear_matrix(H + diff, H)      # trilinear (temporal axis unchanged)
        Lw = _linear_matrix(W + diff, W)
        curve_h = curve_h - min_h + (diff - diff_h) // 2
        curve_w = curve_w - min_w + (diff - diff_w) // 2
        pad_after = T - time_before - time
        ch = np.concatenate([np.full(time_before, curve_h[0]), curve_h,
                             np.full(pad_after, curve_h[-1])]).astype(np.int64)
        cw = np.concatenate([np.full(time_before, curve_w[0]), curve_w,
                             np.full(pad_after, curve_w[-1])]).astype(np.int64)
        Sh = np.stack([Lh[ch[t]:ch[t] + H] for t in range(T)]).astype(np.float32)
        Sw = np.stack([Lw[cw[t]:cw[t] + W] for t in range(T)]).astype(np.float32)
        return Sh, Sw

    def _zoom_matrices(self, T, H, W, step, rng):
        speed, time = self._sample_params_zoom(step, T, rng)
        time_before = int(rng.randint(0, T - time + 1))
        scale = 1.0 + np.arange(time, dtype=np.float32) * speed
        if rng.rand() < 0.5:
            scale = scale[::-1].copy()
        pad_after = T - time_before - time
        scale = np.concatenate([np.full(time_before, scale[0]), scale,
                                np.full(pad_after, scale[-1])]).astype(np.float32)
        Zh = np.zeros((T, H, H), dtype=np.float32)
        Zw = np.zeros((T, W, W), dtype=np.float32)
        for t in range(T):
            s = float(scale[t])
            Hs, Ws = int(math.floor(H * s)), int(math.floor(W * s))
            Bh = _linear_matrix(Hs, H, scale=s)        # bilinear, scale_factor-based
            Bw = _linear_matrix(Ws, W, scale=s)
            top = int(round((Hs - H) / 2.0))           # torchvision center_crop
            left = int(round((Ws - W) / 2.0))
            Zh[t] = Bh[top:top + H]
            Zw[t] = Bw[left:left + W]
        return Zh, Zw

    def _shake_matrices(self, T, H, W, step, rng):
        ampl = self._sample_ampl_shake(step, rng)
        shake_h = self._sample_params_shake(T, ampl, H, rng)
        shake_w = self._sample_params_shake(T, ampl, H, rng)   # res=H in original
        min_h, max_h = int(shake_h.min()), int(shake_h.max())
        min_w, max_w = int(shake_w.min()), int(shake_w.max())
        diff_h, diff_w = max_h - min_h + 1, max_w - min_w + 1
        diff = max(diff_h, diff_w)
        Lh = _linear_matrix(H + diff, H)
        Lw = _linear_matrix(W + diff, W)
        sh = shake_h - min_h + (diff - diff_h) // 2
        sw = shake_w - min_w + (diff - diff_w) // 2
        Kh = np.stack([Lh[sh[t]:sh[t] + H] for t in range(T)]).astype(np.float32)
        Kw = np.stack([Lw[sw[t]:sw[t] + W] for t in range(T)]).astype(np.float32)
        return Kh, Kw

    # -- compose per combo (dedup across batch) ---------------------------------
    def build_matrices(self, shape, step, seed):
        """Returns Mh_combos (n_combo,T,H,H), Mw_combos (n_combo,T,W,W),
        combo_idx [B], clip_flag [B]."""
        B, C, T, H, W = shape
        rng = np.random.RandomState(seed)
        mask_shift = rng.rand(B) < self.prob_shift
        mask_zoom = rng.rand(B) < self.prob_zoom
        mask_shake = rng.rand(B) < self.prob_shake

        # Each stage samples its parameters once per forward (as in PyTorch),
        # shared across all masked batch elements.
        Sh = Sw = Zh = Zw = Kh = Kw = None
        if mask_shift.any():
            Sh, Sw = self._shift_matrices(T, H, W, step, rng)
        if mask_zoom.any():
            Zh, Zw = self._zoom_matrices(T, H, W, step, rng)
        if mask_shake.any():
            Kh, Kw = self._shake_matrices(T, H, W, step, rng)

        combos = {}
        mh_list, mw_list, clip_list = [], [], []
        combo_idx = np.zeros(B, dtype=np.int32)
        clip_flag = np.zeros(B, dtype=np.int32)
        for b in range(B):
            key = (bool(mask_shift[b]), bool(mask_zoom[b]), bool(mask_shake[b]))
            if key not in combos:
                Mh = np.tile(np.eye(H, dtype=np.float32)[None], (T, 1, 1))
                Mw = np.tile(np.eye(W, dtype=np.float32)[None], (T, 1, 1))
                if key[0]:
                    Mh, Mw = Sh @ Mh, Sw @ Mw
                if key[1]:
                    Mh, Mw = Zh @ Mh, Zw @ Mw
                if key[2]:
                    Mh, Mw = Kh @ Mh, Kw @ Mw
                combos[key] = len(mh_list)
                mh_list.append(Mh)
                mw_list.append(Mw)
                clip_list.append(1 if key[2] else 0)    # forward_shake clips [0,1]
            combo_idx[b] = combos[key]
            clip_flag[b] = clip_list[combos[key]]
        Mh_c = np.stack(mh_list).astype(np.float32)
        Mw_c = np.stack(mw_list).astype(np.float32)
        return Mh_c, Mw_c, combo_idx, clip_flag

    def __call__(self, video, step, seed=0):
        # TODO(synk): host-side Python `random` parameter sampling is reproduced
        # with NumPy (deterministic per seed); exact RNG-stream parity with the
        # PyTorch module is not meaningful across frameworks.
        B, C, T, H, W = video.shape
        Mh_c, Mw_c, combo_idx, clip_flag = self.build_matrices(
            (B, C, T, H, W), step, seed)
        n_combo = Mh_c.shape[0]

        # Channel-fuse the left matmul via a block-diagonal Mh for small frames.
        fuse = (C * H <= 256) and (H % 8 == 0)
        if fuse:
            CH = C * H
            mh_host = np.zeros((n_combo, T, CH, CH), dtype=np.float32)
            for c in range(C):
                mh_host[:, :, c * H:(c + 1) * H, c * H:(c + 1) * H] = Mh_c
        else:
            mh_host = Mh_c
        mwT_host = np.ascontiguousarray(np.swapaxes(Mw_c, -1, -2))  # Mw^T on host

        mh = jnp.asarray(mh_host, dtype=jnp.bfloat16)     # bf16 matrices (MXU native)
        mwT = jnp.asarray(mwT_host, dtype=jnp.bfloat16)
        return apply_frame_resample(
            video, mh, mwT,
            jnp.asarray(combo_idx, dtype=jnp.int32),
            jnp.asarray(clip_flag, dtype=jnp.int32),
            fuse_channels=fuse)


# ----------------------------------------------------------------------------
if __name__ == "__main__":
    B, C, T, H, W = 2, 4, 8, 16, 16
    key = jax.random.PRNGKey(0)
    video = jax.random.uniform(key, (B, C, T, H, W), dtype=jnp.float32)

    tc = TransformCamera(prob_shift=1.0, prob_zoom=1.0, prob_shake=1.0, n_steps=2)
    out = jax.block_until_ready(tc(video, step=2, seed=0))
    assert out.shape == (B, C, T, H, W)

    # sanity reference: same composed matrices (f32), plain numpy einsum + clip
    Mh_c, Mw_c, combo_idx, clip_flag = tc.build_matrices((B, C, T, H, W), step=2, seed=0)
    Mh, Mw = Mh_c[combo_idx], Mw_c[combo_idx]
    v_np = np.asarray(video)
    ref = np.einsum("bthi,bctij,btwj->bcthw", Mh, v_np, Mw)
    for b in range(B):
        if clip_flag[b]:
            ref[b] = np.clip(ref[b], 0.0, 1.0)
    assert np.allclose(np.asarray(out), ref, rtol=2e-2, atol=2e-2), "kernel mismatch"

    print("KERNEL_OK")
</pallas_src>

<mosaic_0001>
module attributes {stable_mosaic.version = 11 : i64} {
  func.func @kernel(%arg0: i32, %arg1: i32, %arg2: memref<2xi32, #tpu.memory_space<smem>>, %arg3: memref<2xi32, #tpu.memory_space<smem>>, %arg4: memref<1x2x64x64xbf16, #tpu.memory_space<vmem>>, %arg5: memref<1x2x16x16xbf16, #tpu.memory_space<vmem>>, %arg6: memref<1x4x2x16x16xf32, #tpu.memory_space<vmem>>, %arg7: memref<1x4x2x16x16xf32, #tpu.memory_space<vmem>>) attributes {dimension_semantics = [#tpu.dimension_semantics<parallel>, #tpu.dimension_semantics<parallel>], iteration_bounds = array<i64: 2, 4>, scalar_prefetch = 2 : i64, scratch_operands = 0 : i64, tpu.core_type = #tpu.core_type<tc>, window_params = [{transform_indices = @transform_0, window_bounds = array<i64: 1, 2, 64, 64>}, {transform_indices = @transform_1, window_bounds = array<i64: 1, 2, 16, 16>}, {transform_indices = @transform_2, window_bounds = array<i64: 1, 4, 2, 16, 16>}, {transform_indices = @transform_3, window_bounds = array<i64: 1, 4, 2, 16, 16>}]} {
    %0 = arith.index_cast %arg0 : i32 to index
    %1 = memref.load %arg3[%0] : memref<2xi32, #tpu.memory_space<smem>>
    %c0_i32 = arith.constant 0 : i32
    %2 = arith.cmpi ne, %1, %c0_i32 : i32
    %cst = arith.constant 0.000000e+00 : f32
    %cst_0 = arith.constant -3.000000e+38 : f32
    %3 = arith.select %2, %cst, %cst_0 : f32
    %cst_1 = arith.constant 1.000000e+00 : f32
    %cst_2 = arith.constant 3.000000e+38 : f32
    %4 = arith.select %2, %cst_1, %cst_2 : f32
    %c0 = arith.constant 0 : index
    %c0_3 = arith.constant 0 : index
    %c0_4 = arith.constant 0 : index
    %c0_5 = arith.constant 0 : index
    %5 = vector.load %arg4[%c0, %c0_3, %c0_4, %c0_5] : memref<1x2x64x64xbf16, #tpu.memory_space<vmem>>, vector<1x1x64x64xbf16>
    %6 = vector.shape_cast %5 : vector<1x1x64x64xbf16> to vector<1x64x64xbf16>
    %7 = vector.shape_cast %6 : vector<1x64x64xbf16> to vector<64x64xbf16>
    %c0_6 = arith.constant 0 : index
    %c0_7 = arith.constant 0 : index
    %c0_8 = arith.constant 0 : index
    %c0_9 = arith.constant 0 : index
    %8 = vector.load %arg5[%c0_6, %c0_7, %c0_8, %c0_9] : memref<1x2x16x16xbf16, #tpu.memory_space<vmem>>, vector<1x1x16x16xbf16>
    %9 = vector.shape_cast %8 : vector<1x1x16x16xbf16> to vector<1x16x16xbf16>
    %10 = vector.shape_cast %9 : vector<1x16x16xbf16> to vector<16x16xbf16>
    %c0_10 = arith.constant 0 : index
    %c0_11 = arith.constant 0 : index
    %c0_12 = arith.constant 0 : index
    %c0_13 = arith.constant 0 : index
    %c0_14 = arith.constant 0 : index
    %11 = vector.load %arg6[%c0_10, %c0_11, %c0_12, %c0_13, %c0_14] : memref<1x4x2x16x16xf32, #tpu.memory_space<vmem>>, vector<1x4x1x16x16xf32>
    %12 = vector.shape_cast %11 : vector<1x4x1x16x16xf32> to vector<4x1x16x16xf32>
    %13 = arith.truncf %12 : vector<4x1x16x16xf32> to vector<4x1x16x16xbf16>
    %14 = vector.shape_cast %13 : vector<4x1x16x16xbf16> to vector<64x16xbf16>
    %cst_15 = arith.constant dense<0.000000e+00> : vector<64x16xf32>
    %15 = tpu.matmul %7, %14, %cst_15 {dimension_numbers = #tpu.dot_dimension_numbers<[1], [0], [0], [1], [0, 0, 1, 1], [], []>} : vector<64x64xbf16>, vector<64x16xbf16>, vector<64x16xf32> -> vector<64x16xf32>
    %16 = arith.truncf %15 : vector<64x16xf32> to vector<64x16xbf16>
    %cst_16 = arith.constant dense<0.000000e+00> : vector<64x16xf32>
    %17 = tpu.matmul %16, %10, %cst_16 {dimension_numbers = #tpu.dot_dimension_numbers<[1], [0], [0], [1], [0, 0, 1, 1], [], []>} : vector<64x16xbf16>, vector<16x16xbf16>, vector<64x16xf32> -> vector<64x16xf32>
    %18 = vector.broadcast %3 : f32 to vector<64x16xf32>
    %19 = arith.maximumf %17, %18 : vector<64x16xf32>
    %20 = vector.broadcast %4 : f32 to vector<64x16xf32>
    %21 = arith.minimumf %19, %20 : vector<64x16xf32>
    %22 = vector.shape_cast %21 : vector<64x16xf32> to vector<4x1x16x16xf32>
    %c0_17 = arith.constant 0 : index
    %c0_18 = arith.constant 0 : index
    %c0_19 = arith.constant 0 : index
    %c0_20 = arith.constant 0 : index
    %c0_21 = arith.constant 0 : index
    %23 = vector.load %arg7[%c0_17, %c0_18, %c0_19, %c0_20, %c0_21] : memref<1x4x2x16x16xf32, #tpu.memory_space<vmem>>, vector<1x4x1x16x16xf32>
    %24 = vector.shape_cast %23 : vector<1x4x1x16x16xf32> to vector<4x1x16x16xf32>
    %25 = vector.shape_cast %22 : vector<4x1x16x16xf32> to vector<1x4x1x16x16xf32>
    tpu.vector_store %arg7[%c0_17, %c0_18, %c0_19, %c0_20, %c0_21], %25 {strides = array<i32>} : memref<1x4x2x16x16xf32, #tpu.memory_space<vmem>>, vector<1x4x1x16x16xf32>,
    %c0_22 = arith.constant 0 : index
    %c1 = arith.constant 1 : index
    %c0_23 = arith.constant 0 : index
    %c0_24 = arith.constant 0 : index
    %26 = vector.load %arg4[%c0_22, %c1, %c0_23, %c0_24] : memref<1x2x64x64xbf16, #tpu.memory_space<vmem>>, vector<1x1x64x64xbf16>
    %27 = vector.shape_cast %26 : vector<1x1x64x64xbf16> to vector<1x64x64xbf16>
    %28 = vector.shape_cast %27 : vector<1x64x64xbf16> to vector<64x64xbf16>
    %c0_25 = arith.constant 0 : index
    %c1_26 = arith.constant 1 : index
    %c0_27 = arith.constant 0 : index
    %c0_28 = arith.constant 0 : index
    %29 = vector.load %arg5[%c0_25, %c1_26, %c0_27, %c0_28] : memref<1x2x16x16xbf16, #tpu.memory_space<vmem>>, vector<1x1x16x16xbf16>
    %30 = vector.shape_cast %29 : vector<1x1x16x16xbf16> to vector<1x16x16xbf16>
    %31 = vector.shape_cast %30 : vector<1x16x16xbf16> to vector<16x16xbf16>
    %c0_29 = arith.constant 0 : index
    %c0_30 = arith.constant 0 : index
    %c1_31 = arith.constant 1 : index
    %c0_32 = arith.constant 0 : index
    %c0_33 = arith.constant 0 : index
    %32 = vector.load %arg6[%c0_29, %c0_30, %c1_31, %c0_32, %c0_33] : memref<1x4x2x16x16xf32, #tpu.memory_space<vmem>>, vector<1x4x1x16x16xf32>
    %33 = vector.shape_cast %32 : vector<1x4x1x16x16xf32> to vector<4x1x16x16xf32>
    %34 = arith.truncf %33 : vector<4x1x16x16xf32> to vector<4x1x16x16xbf16>
    %35 = vector.shape_cast %34 : vector<4x1x16x16xbf16> to vector<64x16xbf16>
    %cst_34 = arith.constant dense<0.000000e+00> : vector<64x16xf32>
    %36 = tpu.matmul %28, %35, %cst_34 {dimension_numbers = #tpu.dot_dimension_numbers<[1], [0], [0], [1], [0, 0, 1, 1], [], []>} : vector<64x64xbf16>, vector<64x16xbf16>, vector<64x16xf32> -> vector<64x16xf32>
    %37 = arith.truncf %36 : vector<64x16xf32> to vector<64x16xbf16>
    %cst_35 = arith.constant dense<0.000000e+00> : vector<64x16xf32>
    %38 = tpu.matmul %37, %31, %cst_35 {dimension_numbers = #tpu.dot_dimension_numbers<[1], [0], [0], [1], [0, 0, 1, 1], [], []>} : vector<64x16xbf16>, vector<16x16xbf16>, vector<64x16xf32> -> vector<64x16xf32>
    %39 = vector.broadcast %3 : f32 to vector<64x16xf32>
    %40 = arith.maximumf %38, %39 : vector<64x16xf32>
    %41 = vector.broadcast %4 : f32 to vector<64x16xf32>
    %42 = arith.minimumf %40, %41 : vector<64x16xf32>
    %43 = vector.shape_cast %42 : vector<64x16xf32> to vector<4x1x16x16xf32>
    %c0_36 = arith.constant 0 : index
    %c0_37 = arith.constant 0 : index
    %c1_38 = arith.constant 1 : index
    %c0_39 = arith.constant 0 : index
    %c0_40 = arith.constant 0 : index
    %44 = vector.load %arg7[%c0_36, %c0_37, %c1_38, %c0_39, %c0_40] : memref<1x4x2x16x16xf32, #tpu.memory_space<vmem>>, vector<1x4x1x16x16xf32>
    %45 = vector.shape_cast %44 : vector<1x4x1x16x16xf32> to vector<4x1x16x16xf32>
    %46 = vector.shape_cast %43 : vector<4x1x16x16xf32> to vector<1x4x1x16x16xf32>
    tpu.vector_store %arg7[%c0_36, %c0_37, %c1_38, %c0_39, %c0_40], %46 {strides = array<i32>} : memref<1x4x2x16x16xf32, #tpu.memory_space<vmem>>, vector<1x4x1x16x16xf32>,
    return
  }
  func.func @transform_0(%arg0: i32, %arg1: i32, %arg2: memref<2xi32, #tpu.memory_space<smem>>, %arg3: memref<2xi32, #tpu.memory_space<smem>>) -> (i32, i32, i32, i32) {
    %0 = arith.index_cast %arg0 : i32 to index
    %1 = memref.load %arg2[%0] : memref<2xi32, #tpu.memory_space<smem>>
    %c0_i32 = arith.constant 0 : i32
    %c0_i32_0 = arith.constant 0 : i32
    %c0_i32_1 = arith.constant 0 : i32
    return %1, %arg1, %c0_i32, %c0_i32_0 : i32, i32, i32, i32
  }
  func.func @transform_1(%arg0: i32, %arg1: i32, %arg2: memref<2xi32, #tpu.memory_space<smem>>, %arg3: memref<2xi32, #tpu.memory_space<smem>>) -> (i32, i32, i32, i32) {
    %0 = arith.index_cast %arg0 : i32 to index
    %1 = memref.load %arg2[%0] : memref<2xi32, #tpu.memory_space<smem>>
    %c0_i32 = arith.constant 0 : i32
    %c0_i32_0 = arith.constant 0 : i32
    %c0_i32_1 = arith.constant 0 : i32
    return %1, %arg1, %c0_i32, %c0_i32_0 : i32, i32, i32, i32
  }
  func.func @transform_2(%arg0: i32, %arg1: i32, %arg2: memref<2xi32, #tpu.memory_space<smem>>, %arg3: memref<2xi32, #tpu.memory_space<smem>>) -> (i32, i32, i32, i32, i32) {
    %c0_i32 = arith.constant 0 : i32
    %c0_i32_0 = arith.constant 0 : i32
    %c0_i32_1 = arith.constant 0 : i32
    %c0_i32_2 = arith.constant 0 : i32
    return %arg0, %c0_i32, %arg1, %c0_i32_0, %c0_i32_1 : i32, i32, i32, i32, i32
  }
  func.func @transform_3(%arg0: i32, %arg1: i32, %arg2: memref<2xi32, #tpu.memory_space<smem>>, %arg3: memref<2xi32, #tpu.memory_space<smem>>) -> (i32, i32, i32, i32, i32) {
    %c0_i32 = arith.constant 0 : i32
    %c0_i32_0 = arith.constant 0 : i32
    %c0_i32_1 = arith.constant 0 : i32
    %c0_i32_2 = arith.constant 0 : i32
    return %arg0, %c0_i32, %arg1, %c0_i32_0, %c0_i32_1 : i32, i32, i32, i32, i32
  }
}

</mosaic_0001>

<bundles_post_ra>
// kernel: tpu_custom_call.1
= control target key start
LH: loop header
LB: loop body
LE: loop exit
PB: predicated region body
PF: predicated region fallthrough
CT: control target
= control target key end

     0   :  { %s1534_s18 = smov [#allocation3]   ;;  %s2101_s0 = inlined_call_operand.hbm [shape: s32[2], index: 0, kind: input, shape index: {}]   ;;  %s2102_s2 = inlined_call_operand.hbm [shape: bf16[1,8,64,64], index: 2, kind: input, shape index: {}]   ;;  %s2103_s3 = inlined_call_operand.hbm [shape: bf16[1,8,16,16], index: 3, kind: input, shape index: {}]   ;;  %s2104_s4 = inlined_call_operand.hbm [shape: f32[2,4,8,16,16], index: 4, kind: input, shape index: {}]   ;;  %s2105_s5 = inlined_call_operand.hbm [shape: f32[2,4,8,16,16], index: 5, kind: output, shape index: {}]   ;;  %s2106_s1 = inlined_call_operand.vmem [shape: s32[2], index: 1, kind: input, shape index: {}]  }
   0x1   :  { %2127 = sst [smem:[#allocation39_spill]] %s2105_s5  ;;  %s12_s23 = sshll.u32 %s2106_s1, 4  ;;  %s13_s23 = int_to_ptr.vmem [resolvable:$true] %s12_s23 }
   0x2   :  { %11 = dma.hbm_to_smem %s2101_s0, 16, %s1534_s18, [#allocation2] }
   0x3   :  { %s1340_s24 = scalar_lea.vmem %s13_s23, 16  ;;  %p1345_p1 = scmp.lt.s32.totalorder %s13_s23, %s13_s23 }
   0x4   :  { %p1341_p0 = scmp.ne.s32.totalorder %s13_s23, %s1340_s24  ;;  %p1346_p2 = scmp.lt.s32.totalorder %s1340_s24, %s1340_s24 }
   0x6   :  { %p1347_p3 = por %p1346_p2, %p1345_p1 }
   0x8   :  { %p1348_p4 = pnand %p1347_p3, %p1341_p0 }
   0xa   :  { %1351 = shalt.err (!%p1348_p4)  }
   0xb   :  { %s1535_s25 = smov [#allocation4]  }
   0xc   :  { %15 = dma.vmem_to_smem %s13_s23, 16, %s1535_s25, [#allocation2] }
   0xd   :  { %1460 = dma.done.wait [#allocation2], 32 }
   0xe   :  { %1461 = vsyncadd [#allocation2], 4294967264 }
   0xf   :  { %17 = sfence }
  0x10   :  { %18 = vsyncpa [#allocation6], 0 }
  0x11   :  { %20 = vsyncpa [#allocation6 + $0x1], 0 }
  0x12   :  { %21 = vsyncpa [#allocation9], 0 }
  0x13   :  { %23 = vsyncpa [#allocation9 + $0x1], 0 }
  0x14   :  { %24 = vsyncpa [#allocation7], 0 }
  0x15   :  { %26 = vsyncpa [#allocation7 + $0x1], 0  ;;  %s1589_s0 = smov 0   ;;  %s1591_s1 = smov 0  }
  0x16   :  { %s1593_s26 = smov 0   ;;  %s1595_s27 = smov 0  }
  0x17   :  { %s1597_s28 = smov 0   ;;  %s1599_s29 = smov 0  }
  0x18   :  { %s1601_s30 = smov 0   ;;  %s1603_s6 = smov 0  }
  0x19   :  { %s1605_s7 = smov 0   ;;  %s1607_s8 = smov 0  }
  0x1a   :  { %s1609_s9 = smov 0   ;;  %s1611_s10 = smov 0  }
  0x1b   :  { %s1613_s11 = smov 0   ;;  %s1615_s12 = smov 0  }
  0x1c LB: > { %2128 = sst [smem:[#allocation24_spill]] %s1480_s0  ;;  %s1658_s13 = sadd.s32 4294967295, %s1532_s12   ;;  %s1532_s12 = sphi %s1615_s12, %s32_s12   ;;  %s1528_s11 = sphi %s1613_s11, %s2187_s11   ;;  %s1524_s10 = sphi %s1611_s10, %s2186_s10   ;;  %s1520_s9 = sphi %s1609_s9, %s2185_s9   ;;  %s1516_s8 = sphi %s1607_s8, %s2184_s8   ;;  %s1512_s7 = sphi %s1605_s7, %s2174_s7   ;;  %s1508_s6 = sphi %s1603_s6, %s2183_s6   ;;  %s1504_s30 = sphi %s1601_s30, %s2182_s30   ;;  %s1500_s29 = sphi %s1599_s29, %s2181_s29   ;;  %s1496_s28 = sphi %s1597_s28, %s2180_s28   ;;  %s1492_s27 = sphi %s1595_s27, %s2171_s27   ;;  %s1488_s26 = sphi %s1593_s26, %s2179_s26   ;;  %s1484_s1 = sphi %s1591_s1, %s2178_s1   ;;  %s1480_s0 = sphi %s1589_s0, %s2177_s0  }
  0x1d   : > { %2129 = sst [smem:[#allocation25_spill]] %s1496_s28  ;;  %s41_s15 = sadd.s32 1, %s1524_s10 }
  0x1e   : > { %2130 = sst [smem:[#allocation26_spill]] %s1512_s7  ;;  %s44_s16 = sadd.s32 1, %s1528_s11 }
  0x1f   : > { %2131 = sst [smem:[#allocation27_spill]] %s1516_s8  ;;  %p42_p5 = scmp.ge.s32.totalorder %s41_s15, 4 }
  0x20   : > { %2132 = sst [smem:[#allocation28_spill]] %s1520_s9  ;;  %p62_p6 = scmp.ne.s32.totalorder %s1512_s7, %s1508_s6 }
  0x21   : > { %s1664_s17 = sld [smem:[#allocation3 + %s1528_s11]]  ;;  %s2189_s15 = smov (%p42_p5, %s41_s15), 0 }
  0x22   : > { %2133 = sst [smem:[#allocation29_spill]] %s2189_s15  ;;  %s2191_s16 = smov (!%p42_p5, %s44_s16), %s1528_s11 }
  0x23   : > { %s51_s19 = ssub.s32 %s1524_s10, %s2189_s15  ;;  %p63_p7 = scmp.eq.s32.totalorder %s1532_s12, 0 }
  0x24   : > { %p46_p8 = scmp.ge.s32.totalorder %s2191_s16, 2  ;;  %p68_p9 = scmp.ne.s32.totalorder %s1508_s6, %s1504_s30 }
  0x25   : > { %p1678_p10 = por %p63_p7, %p62_p6  ;;  %p69_p11 = scmp.eq.s32.totalorder %s1658_s13, 0 }
  0x26   : > { %s2193_s16 = smov (%p46_p8, %s2191_s16), 0  ;;  %s78_s22 = sld [smem:[#allocation3 + %s1528_s11]] }
  0x27   : > { %2135 = sst [smem:[#allocation30_spill]] %s2193_s16  ;;  %p1687_p12 = por %p69_p11, %p68_p9 }
  0x28   : > { %s49_s23 = sld [smem:[#allocation3 + %s2193_s16]]  ;;  %s85_s24 = sadd.s32 1, %s1500_s29 }
  0x29   : > { %s2136_s21 = scalar_select %p1687_p12, 1, 0 }
  0x2a   : > { %s79_s25 = sld [smem:[#allocation3 + %s2193_s16]]  ;;  %p92_p13 = scmp.ne.s32.totalorder %s1500_s29, %s1496_s28 }
  0x2b   : > { %2137 = sst [smem:[#allocation31_spill]] %s2136_s21  ;;  %p98_p0 = scmp.ne.s32.totalorder %s1496_s28, %s1492_s27 }
  0x2c   : > { %s108_s30 = ssub.s32 %s1528_s11, %s2193_s16  ;;  %p1703_p1 = por %p92_p13, %p63_p7 }
  0x2d   : > { %s110_s18 = sor.u32 %s108_s30, %s51_s19  ;;  %p1709_p2 = por %p98_p0, %p69_p11 }
  0x2e   : > { %p111_p3 = scmp.eq.s32.totalorder %s110_s18, 0  ;;  %s113_s27 = sadd.s32 1, %s1488_s26 }
  0x2f   : > { %s2139_s15 = scalar_select %p1709_p2, 1, 0 }
  0x30   : > { %p120_p4 = scmp.ne.s32.totalorder %s1488_s26, %s1484_s1  ;;  %s50_s16 = ssub.s32 %s1664_s17, %s49_s23 }
  0x31   : > { %2140 = sst [smem:[#allocation32_spill]] %s2139_s15  ;;  %p126_p5 = scmp.ne.s32.totalorder %s1484_s1, %s1480_s0 }
  0x32   : > { %s52_s30 = sor.u32 %s51_s19, %s50_s16  ;;  %s80_s5 = ssub.s32 %s78_s22, %s79_s25 }
  0x33   : > { %p53_p6 = scmp.eq.s32.totalorder %s52_s30, 0  ;;  %s82_s8 = sor.u32 %s80_s5, %s51_s19 }
  0x34   : > { %p83_p8 = scmp.eq.s32.totalorder %s82_s8, 0  ;;  %p1724_p9 = por %p120_p4, %p63_p7 }
  0x35   : > { %s2142_s18 = sadd.s32 1, %s1512_s7  ;;  %p1744_p13 = por %p126_p5, %p69_p11 }
  0x36   : > { %s2141_s9 = scalar_select %p1724_p9, 1, 0 }
  0x37   : > { %s1731_s15 = scalar_select %p53_p6, %s1512_s7, %s2142_s18  }
  0x38   : > { %s1734_s28 = scalar_select %p83_p8, %s1500_s29, %s85_s24  }
  0x39   : > { %2143 = sst [smem:[#allocation33_spill]] %s1731_s15  ;;  %p152_p0 = scmp.eq.s32.totalorder %s1658_s13, 7 }
  0x3a   : > { %2144 = sst [smem:[#allocation34_spill]] %s1734_s28  ;;  %s2148_s5 = sadd.s32 4294967294, %s1532_s12  }
  0x3b   : > { %s1737_s21 = scalar_select %p111_p3, %s1488_s26, %s113_s27  }
  0x3c   : > { %s2146_s16 = scalar_select %p1744_p13, 1, 0 }
  0x3d   : > { %2145 = sst [smem:[#allocation35_spill]] %s1737_s21  ;;  %p158_p2 = scmp.eq.s32.totalorder %s2148_s5, 7 }
  0x3e   : > { %2147 = sst [smem:[#allocation36_spill]] %s2146_s16  ;;  %p1754_p7 = por %p152_p0, %p120_p4 }
  0x3f   : > { %p1761_p6 = por %p158_p2, %p126_p5  ;;  %p997_p3 = scmp.ge.s32.totalorder %s1532_s12, 8 }
  0x40   : > { %s2149_s8 = scalar_select %p1754_p7, 1, 0 }
  0x41   : > { %s2151_s17 = scalar_select %p1761_p6, 1, 0 }
  0x42   : > { %2150 = sst [smem:[#allocation37_spill]] %s2149_s8  ;;  %174 = sbr.rel (%p997_p3) target bundleno = 147 (0x93), region = 16 }
  0x43   : > { %2152 = sst [smem:[#allocation38_spill]] %s2151_s17  ;;  %s178_s19 = sand.u32 (!%p997_p3), 1, %s1512_s7  }
  0x44   : > { %s998_s22 = sshll.u32 (!%p997_p3), %s178_s19, 6  ;;  %s1079_s27 = sshll.u32 (!%p997_p3), %s1524_s10, 4 }
  0x45   : > { %s205_s30 = sand.u32 (!%p997_p3), 1, %s1500_s29   ;;  %s182_s18 = scalar_lea.vmem (!%p997_p3), [#allocation5], %s998_s22 }
  0x46   : > { %s193_s5 = sshll.u32 (!%p997_p3), %s182_s18, 4  ;;  %s1774_s15 = sshll.u32 (!%p997_p3), %s205_s30, 4  ;;  %s1781_s5 = int_to_ptr.vmem [resolvable:$true] %s193_s5 }
  0x47   : > { %s1163_s23 = scalar_select %p1678_p10, [#allocation3], [#allocation16] }
  0x48   : > { %s1164_s24 = scalar_select %p1678_p10, %s1528_s11, 0 }
  0x49   : > { %s1166_s28 = scalar_select %p1703_p1, [#allocation3], [#allocation17] }
  0x4a   : > { %s183_s25 = sld [smem:[%s1163_s23 + %s1164_s24]]  ;;  %s203_s22 = sand.u32 1, %s1532_s12  }
  0x4b   : > { %s1167_s21 = scalar_select %p1703_p1, %s1528_s11, 0 }
  0x4c   : > { %s1791_s30 = scalar_lea.sflag [#allocation6], %s178_s19 }
  0x4d   : > { %s1783_s0 = sld [smem:[%s1166_s28 + %s1167_s21]] }
  0x50   : > { %s1001_s17 = sshll.u32 %s183_s25, 6 }
  0x51   : > { %s190_s7 = sadd.s32 %s1079_s27, %s1001_s17 }
  0x52   : > { %s1002_s8 = sshll.u32 %s190_s7, 6  ;;  %s1356_s7 = scalar_lea.hbm %s2102_s2, 4096 }
  0x53   : > { %s1788_s24 = scalar_lea.hbm %s2102_s2, %s1002_s8 }
  0x54   : > { %s1352_s18 = scalar_lea.hbm %s1788_s24, 1024  ;;  %p1357_p5 = scmp.lt.s32.totalorder %s1788_s24, %s2102_s2 }
  0x55   : > { %p1353_p11 = scmp.ne.s32.totalorder %s1788_s24, %s1352_s18  ;;  %p1358_p8 = scmp.lt.s32.totalorder %s1356_s7, %s1352_s18 }
  0x57   : > { %p1354_p2 = pnand %p1353_p11, %p1678_p10  ;;  %p1359_p0 = por %p1358_p8, %p1357_p5 }
  0x59   : > { %p1355_p4 = pneg %p1354_p2 }
  0x5b   : > { %p1360_p3 = pnand %p1359_p0, %p1355_p4 }
  0x5d   : > { %1363 = shalt.err (!%p1360_p3)
}
  0x5e   : > { %s1364_s16 = scalar_lea.vmem %s1781_s5, 1024  ;;  %s1536_s8 = smov [#allocation5]  }
  0x5f   : > { %p1365_p6 = scmp.ne.s32.totalorder %s1781_s5, %s1364_s16  ;;  %s1368_s19 = sshll.u32 %s1536_s8, 4  ;;  %s1369_s19 = int_to_ptr.vmem [resolvable:$false] %s1368_s19 }
  0x60   : > { %s1370_s27 = scalar_lea.vmem %s1369_s19, 2048  ;;  %p1371_p7 = scmp.lt.s32.totalorder %s1781_s5, %s1369_s19 }
  0x61   : > { %p1366_p11 = pnand %p1365_p6, %p1678_p10  ;;  %p1372_p13 = scmp.lt.s32.totalorder %s1370_s27, %s1364_s16 }
  0x63   : > { %p1367_p2 = pneg %p1366_p11  ;;  %p1373_p12 = por %p1372_p13, %p1371_p7 }
  0x65   : > { %p1374_p9 = pnand %p1373_p12, %p1367_p2 }
  0x67   : > { %1377 = shalt.err (!%p1374_p9)
}
  0x68   : > { %s1537_s23 = smov 64   ;;  %s1538_s18 = smov 4  }
  0x69   : > { %1165 = dma.hbm_to_vmem [thread:$0]  (%p1678_p10), %s1788_s24, 1024, %s1781_s5, %s1791_s30, %s1537_s23, %s1537_s23, %s1538_s18  }
  0x6a   : > { %s1080_s17 = sshll.u32 %s1524_s10, 2  ;;  %s207_s28 = scalar_lea.vmem [#allocation8], %s1774_s15 }
  0x6b   : > { %s218_s7 = sshll.u32 %s207_s28, 4  ;;  %s1006_s21 = sshll.u32 %s1783_s0, 4  ;;  %s1822_s7 = int_to_ptr.vmem [resolvable:$true] %s218_s7 }
  0x6c   : > { %s215_s25 = sadd.s32 %s1080_s17, %s1006_s21  ;;  %s1831_s20 = scalar_lea.sflag [#allocation9], %s203_s22 }
  0x6d   : > { %s1007_s16 = sshll.u32 %s215_s25, 6  ;;  %s1382_s24 = scalar_lea.hbm %s2103_s3, 1024 }
  0x6e   : > { %s1827_s27 = scalar_lea.hbm %s2103_s3, %s1007_s16 }
  0x6f   : > { %s1378_s5 = scalar_lea.hbm %s1827_s27, 256  ;;  %p1383_p13 = scmp.lt.s32.totalorder %s1827_s27, %s2103_s3 }
  0x70   : > { %p1379_p10 = scmp.ne.s32.totalorder %s1827_s27, %s1378_s5  ;;  %p1384_p7 = scmp.lt.s32.totalorder %s1382_s24, %s1378_s5 }
  0x72   : > { %p1380_p12 = pnand %p1379_p10, %p1703_p1  ;;  %p1385_p6 = por %p1384_p7, %p1383_p13 }
  0x74   : > { %p1381_p9 = pneg %p1380_p12 }
  0x76   : > { %p1386_p4 = pnand %p1385_p6, %p1381_p9 }
  0x78   : > { %1389 = shalt.err (!%p1386_p4)
}
  0x79   : > { %s1390_s22 = scalar_lea.vmem %s1822_s7, 256  ;;  %s1539_s21 = smov [#allocation8]  }
  0x7a   : > { %p1391_p5 = scmp.ne.s32.totalorder %s1822_s7, %s1390_s22  ;;  %s1394_s25 = sshll.u32 %s1539_s21, 4  ;;  %s1395_s25 = int_to_ptr.vmem [resolvable:$false] %s1394_s25 }
  0x7b   : > { %s1396_s16 = scalar_lea.vmem %s1395_s25, 512  ;;  %p1397_p3 = scmp.lt.s32.totalorder %s1822_s7, %s1395_s25 }
  0x7c   : > { %p1392_p8 = pnand %p1391_p5, %p1703_p1  ;;  %p1398_p11 = scmp.lt.s32.totalorder %s1396_s16, %s1390_s22 }
  0x7e   : > { %p1393_p0 = pneg %p1392_p8  ;;  %p1399_p2 = por %p1398_p11, %p1397_p3 }
  0x80   : > { %p1400_p10 = pnand %p1399_p2, %p1393_p0 }
  0x82   : > { %1403 = shalt.err (!%p1400_p10)
}
  0x83   : > { %1168 = dma.hbm_to_vmem [thread:$0]  (%p1703_p1), %s1827_s27, 256, %s1822_s7, %s1831_s20, %s1537_s23, %s1537_s23, %s1538_s18  }
  0x84   : > { %s230_s8 = sand.u32 1, %s1488_s26   ;;  %s1011_s19 = sshll.u32 %s1528_s11, 6 }
  0x85   : > { %s1008_s5 = sshll.u32 %s230_s8, 7  ;;  %s239_s14 = sadd.s32 %s1080_s17, %s1011_s19 }
  0x86   : > { %s1012_s0 = sshll.u32 %s239_s14, 7  ;;  %p2153_p1 = scmp.ne.s32.totalorder %s2141_s9, 0 }
  0x87   : > { %s241_s30 = scalar_lea.hbm %s2104_s4, %s1012_s0  ;;  %s232_s18 = scalar_lea.vmem [#allocation10], %s1008_s5 }
  0x88   : > { %s1169_s23 = scalar_select %p2153_p1, [#allocation0], [#allocation18] }
  0x89   : > { %s254_s7 = sshll.u32 %s232_s18, 4  ;;  %s1540_s28 = smov 2048   ;;  %s255_s7 = int_to_ptr.vmem [resolvable:$true] %s254_s7 }
  0x8a   : > { %s246_s27 = sld [smem:[%s1169_s23]]   ;;  %s1541_s22 = smov 512  }
  0x8b   : > { %1170 = sst [smem:[#allocation13]] (%p2153_p1), %s1540_s28  ;;  %s1542_s17 = smov 4  }
  0x8c   : > { %1171 = sst [smem:[#allocation13 + $0x1]] (%p2153_p1), %s1541_s22  ;;  %s1543_s21 = smov 128  }
  0x8d   : > { %1172 = sst [smem:[#allocation13 + $0x2]] (%p2153_p1), %s1542_s17  ;;  %s1544_s16 = smov 8  }
  0x8e   : > { %1173 = sst [smem:[#allocation13 + $0x3]] (%p2153_p1), %s1543_s21  ;;  %s1545_s19 = smov 131072  }
  0x8f   : > { %1174 = sst [smem:[#allocation13 + $0x4]] (%p2153_p1), %s1543_s21 }
  0x90   : > { %s1013_s25 = sshll.u32 %s246_s27, 26  ;;  %1175 = sst [smem:[#allocation13 + $0x5]] (%p2153_p1), %s1544_s16 }
  0x91   : > { %s1014_s8 = sadd.s32 134217728, %s1013_s25 }
  0x92   : > { %1176 = dma.general (%p2153_p1), %s241_s30, 2048, %s255_s7, %s1831_s20, %s1545_s19, [#allocation13], %s1014_s8, 0  }
  0x93 PF: > { %p1015_p12 = scmp.ge.s32.totalorder %s1532_s12, 1  ;;  %p275_p9 = scmp.lt.s32.totalorder %s1532_s12, 9 }
  0x95   : > { %p276_p13 = pnand %p1015_p12, %p275_p9 }
  0x96   : > { %s2154_s5 = sld [smem:[#allocation31_spill]] (!%p276_p13)  ;;  %s281_s14 = sand.u32 (!%p276_p13), 1, %s1508_s6  }
  0x97   : > { %279 = sbr.rel (%p276_p13) target bundleno = 845 (0x34d), region = 32  ;;  %s1016_s0 = sshll.u32 (!%p276_p13), %s281_s14, 6 }
  0x98   : > { %s282_s15 = scalar_lea.sflag (!%p276_p13), [#allocation6], %s281_s14  ;;  %s1884_s24 = scalar_lea.vmem (!%p276_p13), [#allocation5], %s1016_s0 }
  0x9c   : > { %p2155_p7 = scmp.ne.s32.totalorder %s2154_s5, 0 }
  0x9e   : > { %1463 = dma.done.wait (%p2155_p7), %s282_s15, 1024  }
  0x9f   : > { %1465 = vsyncadd (%p2155_p7), %s282_s15, 4294966272  ;;  %s2156_s9 = sld [smem:[#allocation25_spill]]  ;;  %s290_s30 = sand.u32 1, %s1658_s13  }
  0xa0   : > { %s2157_s20 = sld [smem:[#allocation32_spill]]  ;;  %s291_s7 = scalar_lea.sflag [#allocation9], %s290_s30 }
  0xa5   : > { %s292_s23 = sand.u32 1, %s2156_s9  }
  0xa6   : > { %s1892_s18 = sshll.u32 %s292_s23, 4  ;;  %p2158_p6 = scmp.ne.s32.totalorder %s2157_s20, 0 }
  0xa7   : > { %s294_s27 = scalar_lea.vmem [#allocation8], %s1892_s18 }
  0xa8   : > { %1467 = dma.done.wait (%p2158_p6), %s291_s7, 256  }
  0xa9   : > { %1469 = vsyncadd (%p2158_p6), %s291_s7, 4294967040  ;;  %s2159_s28 = sld [smem:[#allocation36_spill]]  ;;  %s301_s22 = sand.u32 1, %s1484_s1  }
  0xaa   : > { %s1902_s17 = sshll.u32 %s301_s22, 7 }
  0xab   : > { %s1905_s13 = scalar_lea.vmem [#allocation10], %s1902_s17 }
  0xaf   : > { %p2160_p4 = scmp.ne.s32.totalorder %s2159_s28, 0 }
  0xb1   : > { %1471 = dma.done.wait (%p2160_p4), %s291_s7, 2048  }
  0xb2   : > { %1473 = vsyncadd (%p2160_p4), %s291_s7, 4294965248  ;;  %v363_v0 = vld [vmem:[%s1905_s13 + $0x60] sm:$0xff]  ;;  %v364_v1 = vld [vmem:[%s1905_s13 + $0x68] sm:$0xff]  ;;  %vm389_vm0 = vcmask 523264   ;;  %vm477_vm1 = vcmask 130048   ;;  %s2161_s21 = sld [smem:[#allocation28_spill]] }
  0xb3   : > { %v361_v2 = vld [vmem:[%s1905_s13 + $0x40] sm:$0xff]  ;;  %v368_v3 = vpack.c.bf16 %v364_v1, %v363_v0  ;;  %v362_v4 = vld [vmem:[%s1905_s13 + $0x48] sm:$0xff]  ;;  %v1324_v14 = vld [vmem:[%s1884_s24 + $0x10] sm:$0xff]   ;;  %s1960_s19 = scalar_lea.vmem [#allocation11], %s1902_s17  ;;  %s816_s5 = scalar_lea.sflag [#allocation7], %s301_s22 }
  0xb4   : > { %v367_v5 = vpack.c.bf16 %v362_v4, %v361_v2  ;;  %v359_v6 = vld [vmem:[%s1905_s13 + $0x20] sm:$0xff]  ;;  %v360_v7 = vld [vmem:[%s1905_s13 + $0x28] sm:$0xff]  ;;  %v1325_v15 = vld [vmem:[%s1884_s24 + $0x18] sm:$0xff]  }
  0xb5   : > { %1109 = vmatprep.subr.bf16.mxu0 %v368_v3  ;;  %v1322_v8 = vld [vmem:[%s1884_s24] sm:$0xff]   ;;  %v366_v9 = vpack.c.bf16 %v360_v7, %v359_v6  ;;  %v358_v11 = vld [vmem:[%s1905_s13 + $0x8] sm:$0xff]  ;;  %v1049_v17 = vld [vmem:[%s1905_s13 + $0x70] sm:$0xff] }
  0xb6   : > { %1110 = vmatpush3.bf16.msra.mxu0 %v368_v3  ;;  %v357_v10 = vld [vmem:[%s1905_s13] sm:$0xff]  ;;  %1117 = vmatprep.mubr.msk.bf16.mxu0 %vm389_vm0, %v1322_v8  ;;  %v1323_v13 = vld [vmem:[%s1884_s24 + $0x8] sm:$0xff]   ;;  %v1050_v18 = vld [vmem:[%s1905_s13 + $0x78] sm:$0xff] }
  0xb7   : > { %1111 = vmatprep.subr.bf16.mxu0 %v367_v5  ;;  %v365_v12 = vpack.c.bf16 %v358_v11, %v357_v10  ;;  %v1326_v16 = vld [vmem:[%s294_s27] sm:$0xff]   ;;  %v605_v19 = vpack.c.bf16 %v1050_v18, %v1049_v17  ;;  %v1048_v24 = vld [vmem:[%s1905_s13 + $0x58] sm:$0xff]  ;;  %v1328_v42 = vld [vmem:[%s1884_s24 + $0x28] sm:$0xff]  }
  0xb8   : > { %1125 = vmatprep.subr.bf16.mxu1 %v1326_v16  ;;  %v1047_v23 = vld [vmem:[%s1905_s13 + $0x50] sm:$0xff]  ;;  %v1046_v31 = vld [vmem:[%s1905_s13 + $0x38] sm:$0xff]  ;;  %v1327_v39 = vld [vmem:[%s1884_s24 + $0x20] sm:$0xff]   ;;  %s343_s25 = sld [smem:[#allocation4 + %s2161_s21]] }
  0xb9   : > { %1126 = vmatpush3.bf16.msra.mxu1 %v1326_v16  ;;  %v604_v29 = vpack.c.bf16 %v1048_v24, %v1047_v23  ;;  %v1045_v30 = vld [vmem:[%s1905_s13 + $0x30] sm:$0xff]  ;;  %v1044_v36 = vld [vmem:[%s1905_s13 + $0x18] sm:$0xff] }
  0xba   : > { %1112 = vmatpush3.bf16.msra.mxu0 %v367_v5  ;;  %1135 = vmatprep.subr.bf16.mxu1 %v605_v19  ;;  %v603_v34 = vpack.c.bf16 %v1046_v31, %v1045_v30  ;;  %v1043_v35 = vld [vmem:[%s1905_s13 + $0x10] sm:$0xff]  ;;  %v1330_v44 = vld [vmem:[%s1884_s24 + $0x38] sm:$0xff]  }
  0xbb   : > { %1113 = vmatprep.subr.bf16.mxu0 %v366_v9  ;;  %v602_v41 = vpack.c.bf16 %v1044_v36, %v1043_v35  ;;  %v1329_v43 = vld [vmem:[%s1884_s24 + $0x30] sm:$0xff]   ;;  %v1331_v45 = vld [vmem:[%s294_s27 + $0x8] sm:$0xff]  }
  0xbe   : > { %1114 = vmatpush3.bf16.msra.mxu0 %v366_v9  ;;  %p344_p5 = scmp.ne.s32.totalorder %s343_s25, 0 }
  0xbf   : > { %1115 = vmatprep.subr.bf16.mxu0 %v365_v12 }
  0xc0   : > { %s345_s16 = scalar_select %p344_p5, 0.0, -3e+38 }
  0xc1   : > { %s346_s8 = scalar_select %p344_p5, 1.0, 3e+38 }
  0xc2   : > { %1116 = vmatpush3.bf16.msra.mxu0 %v365_v12  ;;  %v1952_v46 = vstv %s345_s16 }
  0xc3   : > { %1151 = vmatprep.subr.bf16.mxu0 %v1331_v45  ;;  %v1954_v48 = vstv %s346_s8 }
  0xc5   : > { %1118 = vmatmul.mubr.msk.bf16.vlgmr.msra.gmra.mxu0 %vm389_vm0, %v1323_v13 }
  0xc6   : > { %1121 = vmatprep.mubr.msk.bf16.mxu0 %vm389_vm0, %v1324_v14  ;;  %1152 = vmatpush3.bf16.msra.mxu0 %v1331_v45 }
  0xcd   : > { %1122 = vmatmul.mubr.msk.bf16.gmra.mxu0 %vm389_vm0, %v1325_v15 }
 0x185   : > { %v1119_v20 = vpop.f32.mrf.mxu0 }
 0x187   : > { %v436_v21 = vpop.f32.mrf.mxu0 }
 0x189   : > { %v1120_v22 = vpop.f32.mrf.mxu0 }
 0x18a   : > { %v468_v27 = vpack.c.bf16 %v1120_v22, %v1119_v20 }
 0x18b   : > { %v439_v25 = vpop.f32.mrf.mxu0 }
 0x18c   : > { %v467_v26 = vpack.c.bf16 %v439_v25, %v436_v21 }
 0x18d   : > { %v1123_v28 = vpop.f32.mrf.mxu0 }
 0x18e   : > { %1127 = vmatprep.mubr.msk.bf16.mxu1 %vm477_vm1, %v467_v26 }
 0x18f   : > { %v452_v32 = vpop.f32.mrf.mxu0  ;;  %1128 = vmatmul.mubr.msk.bf16.vlgmr.msra.gmra.mxu1 %vm477_vm1, %v468_v27 }
 0x190   : > { %1136 = vmatpush3.bf16.msra.mxu1 %v605_v19 }
 0x191   : > { %v1124_v33 = vpop.f32.mrf.mxu0  ;;  %1137 = vmatprep.subr.bf16.mxu1 %v604_v29 }
 0x192   : > { %v470_v40 = vpack.c.bf16 %v1124_v33, %v1123_v28 }
 0x193   : > { %v455_v37 = vpop.f32.mrf.mxu0 }
 0x194   : > { %v469_v38 = vpack.c.bf16 %v455_v37, %v452_v32  ;;  %1138 = vmatpush3.bf16.msra.mxu1 %v604_v29 }
 0x195   : > { %1139 = vmatprep.subr.bf16.mxu1 %v603_v34 }
 0x196   : > { %1131 = vmatprep.mubr.msk.bf16.mxu1 %vm477_vm1, %v469_v38 }
 0x197   : > { %1132 = vmatmul.mubr.msk.bf16.gmra.mxu1 %vm477_vm1, %v470_v40 }
 0x198   : > { %1140 = vmatpush3.bf16.msra.mxu1 %v603_v34  ;;  %1143 = vmatprep.mubr.msk.bf16.mxu1 %vm389_vm0, %v1327_v39 }
 0x199   : > { %1141 = vmatprep.subr.bf16.mxu1 %v602_v41 }
 0x19c   : > { %1142 = vmatpush3.bf16.msra.mxu1 %v602_v41 }
 0x19d   : > { %1161 = vmatprep.subr.bf16.mxu1 %v1331_v45 }
 0x19f   : > { %1144 = vmatmul.mubr.msk.bf16.vlgmr.msra.gmra.mxu1 %vm389_vm0, %v1328_v42 }
 0x1a0   : > { %1147 = vmatprep.mubr.msk.bf16.mxu1 %vm389_vm0, %v1329_v43  ;;  %1162 = vmatpush3.bf16.msra.mxu1 %v1331_v45 }
 0x1a7   : > { %1148 = vmatmul.mubr.msk.bf16.gmra.mxu1 %vm389_vm0, %v1330_v44 }
 0x24f   : > { %v1129_v47 = vpop.f32.mrf.mxu1 }
 0x250   : > { %v558_v49 = vmax.f32 %v1129_v47, %v1952_v46 }
 0x251   : > { %v524_v50 = vpop.f32.mrf.mxu1 }
 0x252   : > { %v567_v51 = vmin.f32 %v558_v49, %v1954_v48  ;;  %v556_v52 = vmax.f32 %v524_v50, %v1952_v46 }
 0x253   : > { %v1130_v53 = vpop.f32.mrf.mxu1 }
 0x254   : > { %575 = vst.msk [vmem:[%s1960_s19 + $0x20] sm:$0xff] %vm477_vm1, %v567_v51  ;;  %v565_v54 = vmin.f32 %v556_v52, %v1954_v48  ;;  %v559_v55 = vmax.f32 %v1130_v53, %v1952_v46 }
 0x255   : > { %v527_v56 = vpop.f32.mrf.mxu1 }
 0x256   : > { %573 = vst.msk [vmem:[%s1960_s19] sm:$0xff] %vm477_vm1, %v565_v54  ;;  %v568_v57 = vmin.f32 %v559_v55, %v1954_v48  ;;  %v557_v58 = vmax.f32 %v527_v56, %v1952_v46 }
 0x257   : > { %v1133_v59 = vpop.f32.mrf.mxu1 }
 0x258   : > { %576 = vst.msk [vmem:[%s1960_s19 + $0x28] sm:$0xff] %vm477_vm1, %v568_v57  ;;  %v566_v60 = vmin.f32 %v557_v58, %v1954_v48  ;;  %v562_v61 = vmax.f32 %v1133_v59, %v1952_v46 }
 0x259   : > { %v540_v62 = vpop.f32.mrf.mxu1 }
 0x25a   : > { %574 = vst.msk [vmem:[%s1960_s19 + $0x8] sm:$0xff] %vm477_vm1, %v566_v60  ;;  %v571_v63 = vmin.f32 %v562_v61, %v1954_v48  ;;  %v560_v0 = vmax.f32 %v540_v62, %v1952_v46 }
 0x25b   : > { %v1134_v1 = vpop.f32.mrf.mxu1 }
 0x25c   : > { %579 = vst.msk [vmem:[%s1960_s19 + $0x60] sm:$0xff] %vm477_vm1, %v571_v63  ;;  %v569_v2 = vmin.f32 %v560_v0, %v1954_v48  ;;  %v563_v3 = vmax.f32 %v1134_v1, %v1952_v46 }
 0x25d   : > { %v543_v4 = vpop.f32.mrf.mxu1 }
 0x25e   : > { %577 = vst.msk [vmem:[%s1960_s19 + $0x40] sm:$0xff] %vm477_vm1, %v569_v2  ;;  %v572_v5 = vmin.f32 %v563_v3, %v1954_v48  ;;  %v561_v6 = vmax.f32 %v543_v4, %v1952_v46 }
 0x25f   : > { %v1145_v7 = vpop.f32.mrf.mxu1 }
 0x260   : > { %580 = vst.msk [vmem:[%s1960_s19 + $0x68] sm:$0xff] %vm477_vm1, %v572_v5  ;;  %v570_v8 = vmin.f32 %v561_v6, %v1954_v48 }
 0x261   : > { %v672_v9 = vpop.f32.mrf.mxu1 }
 0x262   : > { %578 = vst.msk [vmem:[%s1960_s19 + $0x48] sm:$0xff] %vm477_vm1, %v570_v8 }
 0x263   : > { %v1146_v10 = vpop.f32.mrf.mxu1 }
 0x264   : > { %v704_v13 = vpack.c.bf16 %v1146_v10, %v1145_v7 }
 0x265   : > { %v675_v11 = vpop.f32.mrf.mxu1 }
 0x266   : > { %v703_v12 = vpack.c.bf16 %v675_v11, %v672_v9 }
 0x267   : > { %v1149_v14 = vpop.f32.mrf.mxu1 }
 0x268   : > { %1153 = vmatprep.mubr.msk.bf16.mxu0 %vm477_vm1, %v703_v12 }
 0x269   : > { %v688_v15 = vpop.f32.mrf.mxu1  ;;  %1154 = vmatmul.mubr.msk.bf16.vlgmr.msra.gmra.mxu0 %vm477_vm1, %v704_v13 }
 0x26b   : > { %v1150_v16 = vpop.f32.mrf.mxu1 }
 0x26c   : > { %v706_v19 = vpack.c.bf16 %v1150_v16, %v1149_v14 }
 0x26d   : > { %v691_v17 = vpop.f32.mrf.mxu1 }
 0x26e   : > { %v705_v18 = vpack.c.bf16 %v691_v17, %v688_v15 }
 0x270   : > { %1157 = vmatprep.mubr.msk.bf16.mxu1 %vm477_vm1, %v705_v18 }
 0x271   : > { %1158 = vmatmul.mubr.msk.bf16.vlgmr.msra.gmra.mxu1 %vm477_vm1, %v706_v19 }
 0x329   : > { %v1155_v20 = vpop.f32.mrf.mxu0 }
 0x32a   : > { %v792_v21 = vmax.f32 %v1155_v20, %v1952_v46 }
 0x32b   : > { %v759_v22 = vpop.f32.mrf.mxu0 }
 0x32c   : > { %v800_v23 = vmin.f32 %v792_v21, %v1954_v48  ;;  %v790_v24 = vmax.f32 %v759_v22, %v1952_v46 }
 0x32d   : > { %v1156_v25 = vpop.f32.mrf.mxu0 }
 0x32e   : > { %1066 = vst.msk [vmem:[%s1960_s19 + $0x30] sm:$0xff] %vm477_vm1, %v800_v23  ;;  %v798_v26 = vmin.f32 %v790_v24, %v1954_v48  ;;  %v793_v27 = vmax.f32 %v1156_v25, %v1952_v46 }
 0x32f   : > { %v762_v28 = vpop.f32.mrf.mxu0 }
 0x330   : > { %1064 = vst.msk [vmem:[%s1960_s19 + $0x10] sm:$0xff] %vm477_vm1, %v798_v26  ;;  %v801_v29 = vmin.f32 %v793_v27, %v1954_v48  ;;  %v791_v30 = vmax.f32 %v762_v28, %v1952_v46 }
 0x331   : > { %v1159_v31 = vpop.f32.mrf.mxu1 }
 0x332   : > { %1067 = vst.msk [vmem:[%s1960_s19 + $0x38] sm:$0xff] %vm477_vm1, %v801_v29  ;;  %v799_v32 = vmin.f32 %v791_v30, %v1954_v48  ;;  %v796_v33 = vmax.f32 %v1159_v31, %v1952_v46 }
 0x333   : > { %v775_v34 = vpop.f32.mrf.mxu1 }
 0x334   : > { %1065 = vst.msk [vmem:[%s1960_s19 + $0x18] sm:$0xff] %vm477_vm1, %v799_v32  ;;  %v804_v35 = vmin.f32 %v796_v33, %v1954_v48  ;;  %v794_v36 = vmax.f32 %v775_v34, %v1952_v46 }
 0x335   : > { %v1160_v37 = vpop.f32.mrf.mxu1 }
 0x336   : > { %1070 = vst.msk [vmem:[%s1960_s19 + $0x70] sm:$0xff] %vm477_vm1, %v804_v35  ;;  %v802_v38 = vmin.f32 %v794_v36, %v1954_v48  ;;  %v797_v39 = vmax.f32 %v1160_v37, %v1952_v46 }
 0x337   : > { %v778_v40 = vpop.f32.mrf.mxu1 }
 0x338   : > { %1068 = vst.msk [vmem:[%s1960_s19 + $0x50] sm:$0xff] %vm477_vm1, %v802_v38  ;;  %v805_v41 = vmin.f32 %v797_v39, %v1954_v48  ;;  %v795_v42 = vmax.f32 %v778_v40, %v1952_v46 }
 0x33a   : > { %1071 = vst.msk [vmem:[%s1960_s19 + $0x78] sm:$0xff] %vm477_vm1, %v805_v41  ;;  %v803_v43 = vmin.f32 %v795_v42, %v1954_v48 }
 0x33c   : > { %1069 = vst.msk [vmem:[%s1960_s19 + $0x58] sm:$0xff] %vm477_vm1, %v803_v43 }
 0x33d   : > { %s2162_s14 = sld [smem:[#allocation27_spill]]  ;;  %s1075_s24 = sshll.u32 %s2161_s21, 6 }
 0x33e   : > { %s2163_s0 = sld [smem:[#allocation37_spill]]  ;;  %s842_s20 = sshll.u32 %s1960_s19, 4  ;;  %s843_s20 = int_to_ptr.vmem [resolvable:$true] %s842_s20 }
 0x33f   : > { %s2164_s7 = sld [smem:[#allocation39_spill]]  ;;  %s1546_s28 = smov 512  }
 0x340   : > { %s1547_s22 = smov 2048   ;;  %s1548_s17 = smov 4  }
 0x341   : > { %s1549_s13 = smov 128   ;;  %s1550_s21 = smov 8  }
 0x342   : > { %s1551_s25 = smov 131072   ;;  %s1552_s16 = smov 0  }
 0x343   : > { %s1082_s15 = sshll.u32 %s2162_s14, 2 }
 0x344   : > { %s829_s9 = sadd.s32 %s1082_s15, %s1075_s24  ;;  %p2165_p8 = scmp.ne.s32.totalorder %s2163_s0, 0 }
 0x345   : > { %s1076_s30 = sshll.u32 %s829_s9, 7 }
 0x346   : > { %s831_s27 = scalar_lea.hbm %s2164_s7, %s1076_s30  ;;  %1180 = sst [smem:[#allocation15]] (%p2165_p8), %s1546_s28 }
 0x347   : > { %1181 = sst [smem:[#allocation15 + $0x1]] (%p2165_p8), %s1547_s22 }
 0x348   : > { %1182 = sst [smem:[#allocation15 + $0x2]] (%p2165_p8), %s1548_s17 }
 0x349   : > { %1183 = sst [smem:[#allocation15 + $0x3]] (%p2165_p8), %s1549_s13 }
 0x34a   : > { %1184 = sst [smem:[#allocation15 + $0x4]] (%p2165_p8), %s1549_s13 }
 0x34b   : > { %1185 = sst [smem:[#allocation15 + $0x5]] (%p2165_p8), %s1550_s21 }
 0x34c   : > { %1186 = dma.general (%p2165_p8), %s843_s20, 2048, %s831_s27, %s816_s5, %s1551_s25, [#allocation15], %s1552_s16, 0  }
 0x34d PF: > { %s2166_s8 = sld [smem:[#allocation24_spill]]  ;;  %p1192_p0 = scmp.ge.s32.totalorder %s1532_s12, 2 }
 0x34e   : > { %s2167_s19 = sld [smem:[#allocation38_spill]] }
 0x353   : > { %s870_s14 = sand.u32 1, %s2166_s8  }
 0x354   : > { %p2168_p3 = scmp.ne.s32.totalorder %s2167_s19, 0  ;;  %s871_s15 = scalar_lea.sflag [#allocation7], %s870_s14 }
 0x356   : > { %p1189_p11 = pnand %p1192_p0, %p2168_p3 }
 0x358   : > { %p1190_p2 = pneg %p1189_p11 }
 0x35a   : > { %1475 = dma.done.wait (%p1190_p2), %s871_s15, 2048  }
 0x35b   : > { %1477 = vsyncadd (%p1190_p2), %s871_s15, 4294965248  ;;  %s32_s12 = sadd.s32 1, %s1532_s12   ;;  %s2170_s5 = sld [smem:[#allocation35_spill]] }
 0x35c   : > { %p2054_p10 = scmp.ge.s32.totalorder %s32_s12, 10   ;;  %s2171_s27 = sld [smem:[#allocation25_spill]] }
 0x35d   : > { %s2172_s9 = sld [smem:[#allocation34_spill]]  ;;  %s2177_s0 = smov %s1484_s1 }
 0x35e   : > { %s2173_s20 = sld [smem:[#allocation26_spill]]  ;;  %s2178_s1 = smov %s1488_s26 }
 0x35f   : > { %s2174_s7 = sld [smem:[#allocation33_spill]]  ;;  %s2180_s28 = smov %s1500_s29 }
 0x360   : > { %s2175_s23 = sld [smem:[#allocation29_spill]]  ;;  %s2182_s30 = smov %s1508_s6 }
 0x361   : > { %s2176_s18 = sld [smem:[#allocation30_spill]]  ;;  %s2179_s26 = smov %s2170_s5 }
 0x362   : > { %s2184_s8 = smov %s1524_s10 }
 0x363   : > { %s2181_s29 = smov %s2172_s9  ;;  %s2185_s9 = smov %s1528_s11 }
 0x364   : > { %s2183_s6 = smov %s2173_s20  ;;  %31 = sbr.rel (!%p2054_p10) target bundleno = 28 (0x1c), region = 115 }
 0x366   : > { %s2186_s10 = smov %s2175_s23 }
 0x367   : > { %s2187_s11 = smov %s2176_s18 }
 0x369   :  { %876 = vsyncpa [#allocation6], 1 }
 0x36a   :  { %878 = vsyncpa [#allocation6 + $0x1], 1 }
 0x36b   :  { %879 = vsyncpa [#allocation9], 1 }
 0x36c   :  { %881 = vsyncpa [#allocation9 + $0x1], 1 }
 0x36d   :  { %882 = vsyncpa [#allocation7], 1 }
 0x36e   :  { %884 = vsyncpa [#allocation7 + $0x1], 1 }

</bundles_post_ra>
